<compile_context>
chip_gen: v6e
topology: v6e:2x2x1
jax: 0.10.0
libtpu: 0.0.40
codegen_flags: <defaults>
</compile_context>

<pallas_src>
import jax
import jax.numpy as jnp
from jax.experimental import pallas as pl
from jax.experimental.pallas import tpu as pltpu


def _make_dma_copy_kernel(split_axis: int, chunk: int):
    """Build a kernel copying one `chunk`-sized slab (along `split_axis`)
    per grid step with a single direct HBM->HBM DMA."""

    def kernel(x_ref, o_ref, sem):
        start = pl.program_id(0) * chunk
        if split_axis == 0:
            src = x_ref.at[pl.ds(start, chunk)]
            dst = o_ref.at[pl.ds(start, chunk)]
        else:
            src = x_ref.at[:, pl.ds(start, chunk)]
            dst = o_ref.at[:, pl.ds(start, chunk)]
        cp = pltpu.make_async_copy(src, dst, sem)
        cp.start()
        cp.wait()

    return kernel


def linview(x: jax.Array) -> jax.Array:
    """x: (N, C, H, W) (or any (N, ...)) -> (N, prod(rest)), same dtype.

    Matches torch's x.view(x.size(0), -1) for contiguous input.
    """
    n = x.shape[0]
    flat = 1
    for d in x.shape[1:]:
        flat *= d

    # Metadata-only flatten (row-major contiguous input).
    # TODO(synk): if profiling ever shows XLA materializing a real copy here
    # (input not in default layout after a conv), fold the flatten into the
    # kernel by DMA-ing directly from the original N-D array instead.
    x2 = jnp.reshape(x, (n, flat))

    # Split the copy into two slabs along whichever axis divides evenly so
    # v7x's two TensorCores each issue half of the DMA traffic; otherwise a
    # single whole-array DMA.  Row slabs are fully contiguous in HBM.
    if n >= 2 and n % 2 == 0:
        split_axis, chunk, num_chunks = 0, n // 2, 2
    elif flat >= 2 and flat % 2 == 0:
        split_axis, chunk, num_chunks = 1, flat // 2, 2
    else:
        split_axis, chunk, num_chunks = 0, n, 1

    return pl.pallas_call(
        _make_dma_copy_kernel(split_axis, chunk),
        out_shape=jax.ShapeDtypeStruct((n, flat), x.dtype),
        grid=(num_chunks,),
        in_specs=[pl.BlockSpec(memory_space=pl.ANY)],
        out_specs=pl.BlockSpec(memory_space=pl.ANY),
        scratch_shapes=[pltpu.SemaphoreType.DMA],
        compiler_params=pltpu.CompilerParams(
            dimension_semantics=("parallel",),
        ),
    )(x2)


if __name__ == "__main__":
    key = jax.random.PRNGKey(0)
    # Small NCHW input consistent with a conv-net feature map feeding LinView.
    x = jax.random.normal(key, (2, 4, 16, 16), dtype=jnp.float32)

    out = linview(x)
    jax.block_until_ready(out)

    # Reference: torch's x.view(x.size(0), -1) on contiguous NCHW.
    ref = x.reshape(x.shape[0], -1)
    assert out.shape == ref.shape, (out.shape, ref.shape)
    assert out.dtype == ref.dtype, (out.dtype, ref.dtype)
    assert bool(jnp.array_equal(out, ref)), "mismatch vs reference flatten"

    print("KERNEL_OK")
</pallas_src>

<mosaic_0001>
module attributes {stable_mosaic.version = 11 : i64} {
  func.func @kernel(%arg0: i32, %arg1: memref<2x1024xf32, #tpu.memory_space<any>>, %arg2: memref<2x1024xf32, #tpu.memory_space<any>>, %arg3: memref<!tpu.dma_semaphore, #tpu.memory_space<semaphore_mem>>) attributes {dimension_semantics = [#tpu.dimension_semantics<parallel>], iteration_bounds = array<i64: 2>, scalar_prefetch = 0 : i64, scratch_operands = 1 : i64, tpu.core_type = #tpu.core_type<tc>, window_params = [{}, {}]} {
    %c1_i32 = arith.constant 1 : i32
    %0 = arith.muli %arg0, %c1_i32 : i32
    %c0_i32 = arith.constant 0 : i32
    %1 = tpu.memref_slice %arg1[%0, %c0_i32] : memref<2x1024xf32, #tpu.memory_space<any>> -> memref<1x1024xf32, #tpu.memory_space<any>>
    %c0_i32_0 = arith.constant 0 : i32
    %2 = tpu.memref_slice %arg2[%0, %c0_i32_0] : memref<2x1024xf32, #tpu.memory_space<any>> -> memref<1x1024xf32, #tpu.memory_space<any>>
    tpu.enqueue_dma source(%1 : memref<1x1024xf32, #tpu.memory_space<any>>) target(%2 : memref<1x1024xf32, #tpu.memory_space<any>>) target_semaphore(%arg3 : memref<!tpu.dma_semaphore, #tpu.memory_space<semaphore_mem>>)
    %c0_i32_1 = arith.constant 0 : i32
    %3 = tpu.memref_slice %arg1[%0, %c0_i32_1] : memref<2x1024xf32, #tpu.memory_space<any>> -> memref<1x1024xf32, #tpu.memory_space<any>>
    %c0_i32_2 = arith.constant 0 : i32
    %4 = tpu.memref_slice %arg2[%0, %c0_i32_2] : memref<2x1024xf32, #tpu.memory_space<any>> -> memref<1x1024xf32, #tpu.memory_space<any>>
    tpu.wait_dma2 semaphore(%arg3 : memref<!tpu.dma_semaphore, #tpu.memory_space<semaphore_mem>>) src(%3 : memref<1x1024xf32, #tpu.memory_space<any>>) dst(%4 : memref<1x1024xf32, #tpu.memory_space<any>>)
    return
  }
}

</mosaic_0001>

<bundles_post_ra>
// kernel: tpu_custom_call.1
= control target key start
LH: loop header
LB: loop body
LE: loop exit
PB: predicated region body
PF: predicated region fallthrough
CT: control target
= control target key end

     0   :  { %s79_s6 = smov 0   ;;  %s104_s0 = inlined_call_operand.hbm [shape: f32[2,1024], index: 0, kind: input, shape index: {}]   ;;  %s105_s1 = inlined_call_operand.hbm [shape: f32[2,1024], index: 1, kind: output, shape index: {}]  }
   0x1 LB: > { %s13_s7 = sshrl.u32 %s81_s6, 1  ;;  %s14_s8 = sand.u32 1, %s81_s6   ;;  %s81_s6 = sphi %s79_s6, %s11_s6  }
   0x2   : > { %s56_s9 = sshll.u32 %s13_s7, 4  ;;  %s83_s11 = smov 32  }
   0x3   : > { %s16_s10 = sadd.s32 %s56_s9, %s14_s8  ;;  %27 = sst [smem:[#allocation4]] %s83_s11 }
   0x4   : > { %s57_s12 = sshll.u32 %s16_s10, 4  ;;  %29 = sst [smem:[#allocation4 + $0x1]] %s83_s11 }
   0x5   : > { %s18_s15 = scalar_lea.hbm %s104_s0, %s57_s12  ;;  %s20_s18 = scalar_lea.hbm %s105_s1, %s57_s12 }
   0x6   : > { %s84_s19 = smov 1   ;;  %s85_s20 = smov [#allocation2]  }
   0x7   : > { %31 = sst [smem:[#allocation4 + $0x2]] %s84_s19  ;;  %s86_s21 = smov 131072  }
   0x8   : > { %s87_s22 = smov 0  }
   0x9   : > { %33 = dma.general %s18_s15, 128, %s20_s18, %s85_s20, %s86_s21, [#allocation4], %s87_s22, 0  }
   0xa   : > { %77 = dma.done.wait [#allocation2], 128 }
   0xb   : > { %78 = vsyncadd [#allocation2], 4294967168  ;;  %s11_s6 = sadd.s32 1, %s81_s6  }
   0xc   : > { %p8_p0 = scmp.ge.s32.totalorder %s11_s6, 2  }
   0xe   :  { %10 = sbr.rel (!%p8_p0) target bundleno = 1 (0x1), region = 23 }
  0x13   :  { %37 = vsyncmov [#allocation2] }
  0x16   :  { %s38_s23 = vpop.sfrf %37 }
  0x17   :  { %p59_p1 = scmp.ne.s32.totalorder %s38_s23, 0 }
  0x19   :  { %42 = shalt.err (%p59_p1)  }

</bundles_post_ra>
